<compile_context>
chip_gen: v7x
topology: tpu7x:2x2x1
jax: 0.10.0
libtpu: 0.0.40
codegen_flags: <defaults>
</compile_context>

<pallas_src>
import functools

import jax
import jax.numpy as jnp
from jax.experimental import pallas as pl
from jax.experimental.pallas import tpu as pltpu


def _round_up(n, m):
    return ((n + m - 1) // m) * m


def _vmem_limit_bytes():
    # 64 MiB on 128-MiB chips (v5e/v6e); leave ~8 MiB headroom on v7x (64 MiB).
    try:
        cap = pltpu.get_tpu_info().vmem_capacity_bytes
    except Exception:
        cap = 128 << 20
    return int(min(64 << 20, max(cap - (8 << 20), 16 << 20)))


def _resident_spec(block_shape, index_map):
    """BlockSpec for operands whose block index is constant over the grid.

    Single-buffering avoids a useless second VMEM buffer (W1 alone is ~2 MiB
    at BERT sizes) -- headroom that matters most on v7x's 64 MiB VMEM.
    """
    try:
        return pl.BlockSpec(block_shape, index_map, pipeline_mode=pl.Buffered(1))
    except Exception:  # older JAX without pipeline_mode support
        return pl.BlockSpec(block_shape, index_map)


# ---------------------------------------------------------------------------
# Kernel 1: h = LayerNorm(ReLU(x @ W1 + b1)) * gamma + beta        -> [rt, M]
# ---------------------------------------------------------------------------
def _mlm_hidden_kernel(x_ref, w1_ref, b1_ref, gamma_ref, beta_ref, h_ref, *, eps):
    # Linear 1 + ReLU (MXU, f32 accumulate).
    h = jnp.dot(x_ref[...], w1_ref[...], preferred_element_type=jnp.float32)
    h = jnp.maximum(h + b1_ref[...], 0.0)

    # LayerNorm over the last dim -- centered two-pass form, f32.
    mean = jnp.mean(h, axis=-1, keepdims=True)
    d = h - mean
    var = jnp.mean(d * d, axis=-1, keepdims=True)
    h = d * jax.lax.rsqrt(var + eps)
    h = h * gamma_ref[...] + beta_ref[...]

    h_ref[...] = h.astype(h_ref.dtype)


# ---------------------------------------------------------------------------
# Kernel 2: logits tile = h_tile @ W2_tile + b2_tile               -> [rt, tv]
# ---------------------------------------------------------------------------
def _mlm_logits_kernel(h_ref, w2_ref, b2_ref, o_ref):
    out = jnp.dot(h_ref[...], w2_ref[...], preferred_element_type=jnp.float32)
    o_ref[...] = (out + b2_ref[...]).astype(o_ref.dtype)


def mask_lm_forward(x, pred_mlm_positions, params, *, eps=1e-5,
                    row_tile=256, vocab_tile=4096,
                    compute_dtype=jnp.bfloat16, out_dtype=jnp.bfloat16):
    """x: [B, S, H], pred_mlm_positions: [B, P] int -> logits [B, P, V]."""
    w1, b1, gamma, beta, w2, b2 = params
    B, S, H = x.shape
    P = pred_mlm_positions.shape[1]
    M = w1.shape[1]
    V = w2.shape[1]

    # --- gather masked positions (indexing glue, plain JAX) ----------------
    # mlm_input[b, p, :] = x[b, pred_mlm_positions[b, p], :]
    mlm_input = jnp.take_along_axis(
        x, pred_mlm_positions[:, :, None].astype(jnp.int32), axis=1)   # [B,P,H]
    flat = mlm_input.reshape(B * P, H)

    # --- pad rows to a multiple of 16 (bf16 sublane packing) ---------------
    N = B * P
    rt = min(row_tile, _round_up(N, 16))
    N_pad = _round_up(N, rt)
    if N_pad != N:
        flat = jnp.pad(flat, ((0, N_pad - N), (0, 0)))

    # --- pad vocab to a lane-dense multiple of the vocab tile --------------
    tv = min(vocab_tile, _round_up(V, 128))
    V_pad = _round_up(V, tv)
    if V_pad != V:
        w2 = jnp.pad(w2, ((0, 0), (0, V_pad - V)))
        b2 = jnp.pad(b2, ((0, 0), (0, V_pad - V)))

    # --- dtypes: bf16 matmul operands, f32 bias / LayerNorm params ---------
    flat = flat.astype(compute_dtype)
    w1 = w1.astype(compute_dtype)
    w2 = w2.astype(compute_dtype)
    b1 = b1.astype(jnp.float32)
    gamma = gamma.astype(jnp.float32)
    beta = beta.astype(jnp.float32)
    b2 = b2.astype(jnp.float32)

    vmem_limit = _vmem_limit_bytes()

    # ------------------------------------------------------------------ 1 --
    # Linear1 + ReLU + LayerNorm, computed exactly once per row tile.  The
    # bf16 [N_pad, M] intermediate round-trips HBM (N*M*2 bytes, trivial
    # compared with the W2 / logits streams) instead of being recomputed for
    # every vocab tile.
    hidden_kernel = functools.partial(_mlm_hidden_kernel, eps=eps)
    h = pl.pallas_call(
        hidden_kernel,
        out_shape=jax.ShapeDtypeStruct((N_pad, M), compute_dtype),
        grid_spec=pltpu.PrefetchScalarGridSpec(
            num_scalar_prefetch=0,
            grid=(N_pad // rt,),
            in_specs=[
                pl.BlockSpec((rt, H), lambda i: (i, 0)),      # token rows
                _resident_spec((H, M), lambda i: (0, 0)),     # W1 (resident)
                _resident_spec((1, M), lambda i: (0, 0)),     # b1
                _resident_spec((1, M), lambda i: (0, 0)),     # gamma
                _resident_spec((1, M), lambda i: (0, 0)),     # beta
            ],
            out_specs=pl.BlockSpec((rt, M), lambda i: (i, 0)),
        ),
        compiler_params=pltpu.CompilerParams(
            dimension_semantics=("parallel",),
            vmem_limit_bytes=vmem_limit),
    )(flat, w1, b1, gamma, beta)

    # ------------------------------------------------------------------ 2 --
    # Vocab-tiled Linear2.  Vocab tiles OUTER, row tiles INNER -> the W2 block
    # index is constant along the inner axis, so each W2 tile is DMA'd from
    # HBM exactly once.  Output tiles are disjoint -> both axes "parallel".
    out_flat = pl.pallas_call(
        _mlm_logits_kernel,
        out_shape=jax.ShapeDtypeStruct((N_pad, V_pad), out_dtype),
        grid_spec=pltpu.PrefetchScalarGridSpec(
            num_scalar_prefetch=0,
            grid=(V_pad // tv, N_pad // rt),
            in_specs=[
                pl.BlockSpec((rt, M), lambda j, i: (i, 0)),   # hidden rows
                pl.BlockSpec((M, tv), lambda j, i: (0, j)),   # W2 vocab tile
                pl.BlockSpec((1, tv), lambda j, i: (0, j)),   # b2 vocab tile
            ],
            out_specs=pl.BlockSpec((rt, tv), lambda j, i: (i, j)),
        ),
        compiler_params=pltpu.CompilerParams(
            dimension_semantics=("parallel", "parallel"),
            vmem_limit_bytes=vmem_limit),
    )(h, w2, b2)

    return out_flat[:N, :V].reshape(B, P, V)


def init_params(key, hidden_size, mlm_hidden_size, vocab_size):
    k1, k2, k3, k4 = jax.random.split(key, 4)
    s1 = 1.0 / jnp.sqrt(hidden_size)
    s2 = 1.0 / jnp.sqrt(mlm_hidden_size)
    w1 = jax.random.uniform(k1, (hidden_size, mlm_hidden_size), jnp.float32, -s1, s1)
    b1 = jax.random.uniform(k2, (1, mlm_hidden_size), jnp.float32, -s1, s1)
    gamma = jnp.ones((1, mlm_hidden_size), jnp.float32)
    beta = jnp.zeros((1, mlm_hidden_size), jnp.float32)
    w2 = jax.random.uniform(k3, (mlm_hidden_size, vocab_size), jnp.float32, -s2, s2)
    b2 = jax.random.uniform(k4, (1, vocab_size), jnp.float32, -s2, s2)
    return (w1, b1, gamma, beta, w2, b2)


def _reference(x, positions, params, eps=1e-5):
    """Pure-JAX f32 reference mirroring the PyTorch forward."""
    w1, b1, gamma, beta, w2, b2 = params
    gathered = jnp.take_along_axis(x, positions[:, :, None], axis=1)
    h = jnp.maximum(gathered @ w1 + b1[0], 0.0)
    mean = h.mean(-1, keepdims=True)
    var = ((h - mean) ** 2).mean(-1, keepdims=True)
    h = (h - mean) / jnp.sqrt(var + eps) * gamma[0] + beta[0]
    return h @ w2 + b2[0]


if __name__ == "__main__":
    # Small shapes chosen to exercise both grid axes and both paddings:
    #   rows:  N = B*P = 24 -> rt = 16 -> N_pad = 32 (two row tiles)
    #   vocab: V = 320 -> padded to 384 (three 128-wide vocab tiles)
    B, S, H = 2, 16, 64          # batch, seq_len, hidden_size
    P = 12                       # number of masked (predicted) positions
    M = 128                      # mlm_hidden_size
    V = 320                      # vocab_size (ragged on purpose)

    key = jax.random.PRNGKey(0)
    kx, kp, kw = jax.random.split(key, 3)

    x = jax.random.normal(kx, (B, S, H), jnp.float32)
    pred_mlm_positions = jax.random.randint(kp, (B, P), 0, S, jnp.int32)
    params = init_params(kw, H, M, V)

    out = mask_lm_forward(x, pred_mlm_positions, params,
                          row_tile=16, vocab_tile=128)
    out = jax.block_until_ready(out)

    ref = _reference(x, pred_mlm_positions, params)
    assert out.shape == (B, P, V), out.shape
    assert out.dtype == jnp.bfloat16, out.dtype
    # bf16 operands, bf16 intermediate h, bf16 logits vs f32 reference.
    err = float(jnp.max(jnp.abs(out.astype(jnp.float32) - ref)))
    assert jnp.allclose(out.astype(jnp.float32), ref, atol=1e-1, rtol=1e-1), err

    print("KERNEL_OK")
</pallas_src>

<mosaic_0001>
module attributes {stable_mosaic.version = 11 : i64} {
  func.func @_mlm_hidden_kernel(%arg0: i32, %arg1: memref<16x64xbf16, #tpu.memory_space<vmem>>, %arg2: memref<64x128xbf16, #tpu.memory_space<vmem>>, %arg3: memref<1x128xf32, #tpu.memory_space<vmem>>, %arg4: memref<1x128xf32, #tpu.memory_space<vmem>>, %arg5: memref<1x128xf32, #tpu.memory_space<vmem>>, %arg6: memref<16x128xbf16, #tpu.memory_space<vmem>>) attributes {dimension_semantics = [#tpu.dimension_semantics<parallel>], iteration_bounds = array<i64: 2>, scalar_prefetch = 0 : i64, scratch_operands = 0 : i64, tpu.core_type = #tpu.core_type<tc>, window_params = [{transform_indices = @transform_0, window_bounds = array<i64: 16, 64>}, {pipeline_mode = #tpu.pipeline_mode<synchronous>, transform_indices = @transform_1, window_bounds = array<i64: 64, 128>}, {pipeline_mode = #tpu.pipeline_mode<synchronous>, transform_indices = @transform_2, window_bounds = array<i64: 1, 128>}, {pipeline_mode = #tpu.pipeline_mode<synchronous>, transform_indices = @transform_3, window_bounds = array<i64: 1, 128>}, {pipeline_mode = #tpu.pipeline_mode<synchronous>, transform_indices = @transform_4, window_bounds = array<i64: 1, 128>}, {transform_indices = @transform_5, window_bounds = array<i64: 16, 128>}]} {
    %c0 = arith.constant 0 : index
    %c0_0 = arith.constant 0 : index
    %0 = vector.load %arg1[%c0, %c0_0] : memref<16x64xbf16, #tpu.memory_space<vmem>>, vector<16x64xbf16>
    %c0_1 = arith.constant 0 : index
    %c0_2 = arith.constant 0 : index
    %1 = vector.load %arg2[%c0_1, %c0_2] : memref<64x128xbf16, #tpu.memory_space<vmem>>, vector<64x128xbf16>
    %cst = arith.constant dense<0.000000e+00> : vector<16x128xf32>
    %2 = tpu.matmul %0, %1, %cst {dimension_numbers = #tpu.dot_dimension_numbers<[1], [0], [0], [1], [0, 0, 1, 1], [], []>} : vector<16x64xbf16>, vector<64x128xbf16>, vector<16x128xf32> -> vector<16x128xf32>
    %c0_3 = arith.constant 0 : index
    %c0_4 = arith.constant 0 : index
    %3 = vector.load %arg3[%c0_3, %c0_4] : memref<1x128xf32, #tpu.memory_space<vmem>>, vector<1x128xf32>
    %4 = vector.broadcast %3 : vector<1x128xf32> to vector<16x128xf32>
    %5 = arith.addf %2, %4 : vector<16x128xf32>
    %cst_5 = arith.constant 0.000000e+00 : f32
    %6 = vector.broadcast %cst_5 : f32 to vector<16x128xf32>
    %7 = arith.maximumf %5, %6 : vector<16x128xf32>
    %cst_6 = arith.constant dense<0.000000e+00> : vector<16xf32>
    %8 = vector.multi_reduction <add>, %7, %cst_6 [1] : vector<16x128xf32> to vector<16xf32>
    %9 = vector.shape_cast %8 : vector<16xf32> to vector<16x1xf32>
    %cst_7 = arith.constant 1.280000e+02 : f32
    %10 = vector.broadcast %cst_7 : f32 to vector<16x1xf32>
    %11 = arith.divf %9, %10 : vector<16x1xf32>
    %12 = vector.broadcast %11 : vector<16x1xf32> to vector<16x128xf32>
    %13 = arith.subf %7, %12 : vector<16x128xf32>
    %14 = arith.mulf %13, %13 : vector<16x128xf32>
    %cst_8 = arith.constant dense<0.000000e+00> : vector<16xf32>
    %15 = vector.multi_reduction <add>, %14, %cst_8 [1] : vector<16x128xf32> to vector<16xf32>
    %16 = vector.shape_cast %15 : vector<16xf32> to vector<16x1xf32>
    %cst_9 = arith.constant 1.280000e+02 : f32
    %17 = vector.broadcast %cst_9 : f32 to vector<16x1xf32>
    %18 = arith.divf %16, %17 : vector<16x1xf32>
    %cst_10 = arith.constant 9.99999974E-6 : f32
    %19 = vector.broadcast %cst_10 : f32 to vector<16x1xf32>
    %20 = arith.addf %18, %19 : vector<16x1xf32>
    %21 = math.rsqrt %20 : vector<16x1xf32>
    %22 = vector.broadcast %21 : vector<16x1xf32> to vector<16x128xf32>
    %23 = arith.mulf %13, %22 : vector<16x128xf32>
    %c0_11 = arith.constant 0 : index
    %c0_12 = arith.constant 0 : index
    %24 = vector.load %arg4[%c0_11, %c0_12] : memref<1x128xf32, #tpu.memory_space<vmem>>, vector<1x128xf32>
    %25 = vector.broadcast %24 : vector<1x128xf32> to vector<16x128xf32>
    %26 = arith.mulf %23, %25 : vector<16x128xf32>
    %c0_13 = arith.constant 0 : index
    %c0_14 = arith.constant 0 : index
    %27 = vector.load %arg5[%c0_13, %c0_14] : memref<1x128xf32, #tpu.memory_space<vmem>>, vector<1x128xf32>
    %28 = vector.broadcast %27 : vector<1x128xf32> to vector<16x128xf32>
    %29 = arith.addf %26, %28 : vector<16x128xf32>
    %30 = arith.truncf %29 : vector<16x128xf32> to vector<16x128xbf16>
    %c0_15 = arith.constant 0 : index
    %c0_16 = arith.constant 0 : index
    %31 = vector.load %arg6[%c0_15, %c0_16] : memref<16x128xbf16, #tpu.memory_space<vmem>>, vector<16x128xbf16>
    tpu.vector_store %arg6[%c0_15, %c0_16], %30 {strides = array<i32>} : memref<16x128xbf16, #tpu.memory_space<vmem>>, vector<16x128xbf16>,
    return
  }
  func.func @transform_0(%arg0: i32) -> (i32, i32) {
    %c0_i32 = arith.constant 0 : i32
    %c0_i32_0 = arith.constant 0 : i32
    return %arg0, %c0_i32 : i32, i32
  }
  func.func @transform_1(%arg0: i32) -> (i32, i32) {
    %c0_i32 = arith.constant 0 : i32
    %c0_i32_0 = arith.constant 0 : i32
    %c0_i32_1 = arith.constant 0 : i32
    return %c0_i32, %c0_i32_0 : i32, i32
  }
  func.func @transform_2(%arg0: i32) -> (i32, i32) {
    %c0_i32 = arith.constant 0 : i32
    %c0_i32_0 = arith.constant 0 : i32
    %c0_i32_1 = arith.constant 0 : i32
    return %c0_i32, %c0_i32_0 : i32, i32
  }
  func.func @transform_3(%arg0: i32) -> (i32, i32) {
    %c0_i32 = arith.constant 0 : i32
    %c0_i32_0 = arith.constant 0 : i32
    %c0_i32_1 = arith.constant 0 : i32
    return %c0_i32, %c0_i32_0 : i32, i32
  }
  func.func @transform_4(%arg0: i32) -> (i32, i32) {
    %c0_i32 = arith.constant 0 : i32
    %c0_i32_0 = arith.constant 0 : i32
    %c0_i32_1 = arith.constant 0 : i32
    return %c0_i32, %c0_i32_0 : i32, i32
  }
  func.func @transform_5(%arg0: i32) -> (i32, i32) {
    %c0_i32 = arith.constant 0 : i32
    %c0_i32_0 = arith.constant 0 : i32
    return %arg0, %c0_i32 : i32, i32
  }
}

</mosaic_0001>

<bundles_post_ra>
// kernel: tpu_custom_call.1
= control target key start
LH: loop header
LB: loop body
LE: loop exit
PB: predicated region body
PF: predicated region fallthrough
CT: control target
= control target key end

     0   :  { %10 = vsyncpa [#allocation3], 0  ;;  %s1276_s0 = inlined_call_operand.hbm [shape: bf16[32,64], index: 0, kind: input, shape index: {}]   ;;  %s1277_s1 = inlined_call_operand.hbm [shape: bf16[64,128], index: 1, kind: input, shape index: {}]   ;;  %s1278_s2 = inlined_call_operand.hbm [shape: f32[1,128], index: 2, kind: input, shape index: {}]   ;;  %s1279_s3 = inlined_call_operand.hbm [shape: f32[1,128], index: 3, kind: input, shape index: {}]   ;;  %s1280_s4 = inlined_call_operand.hbm [shape: f32[1,128], index: 4, kind: input, shape index: {}]   ;;  %s1281_s5 = inlined_call_operand.hbm [shape: bf16[32,128], index: 5, kind: output, shape index: {}]  }
   0x1   :  { %12 = vsyncpa [#allocation3 + $0x1], 0 }
   0x2   :  { %13 = vsyncpa [#allocation6], 0 }
   0x3   :  { %14 = vsyncpa [#allocation9], 0 }
   0x4   :  { %15 = vsyncpa [#allocation4], 0 }
   0x5   :  { %17 = vsyncpa [#allocation4 + $0x1], 0  ;;  %s988_s18 = smov 0   ;;  %s990_s19 = smov 0  }
   0x6   :  { %s992_s20 = smov 0   ;;  %s994_s21 = smov 0  }
   0x7 LB: > { %s1009_s22 = sadd.s32 4294967295, %s944_s21   ;;  %s567_s23 = sadd.s32 4294967294, %s944_s21   ;;  %s944_s21 = sphi %s994_s21, %s1304_s21   ;;  %s940_s20 = sphi %s992_s20, %s1303_s20   ;;  %s936_s19 = sphi %s990_s19, %s1302_s19   ;;  %s932_s18 = sphi %s988_s18, %s1301_s18  }
   0x8   : > { %p43_p0 = scmp.ne.s32.totalorder %s936_s19, %s932_s18  ;;  %p1282_p1 = scmp.eq.s32.totalorder %s1009_s22, 0 }
   0x9   : > { %p157_p3 = scmp.eq.s32.totalorder %s567_s23, 1  ;;  %p568_p5 = scmp.ge.s32.totalorder %s944_s21, 1 }
   0xa   : > { %p1018_p4 = por %p1282_p1, %p43_p0  ;;  %p164_p7 = scmp.lt.s32.totalorder %s944_s21, 3 }
   0xb   : > { %p1023_p6 = por %p157_p3, %p43_p0  ;;  %s946_s27 = smov [#allocation5]  }
   0xc   : > { %s1285_s24 = scalar_select %p1018_p4, 1, 0 }
   0xd   : > { %s1286_s25 = scalar_select %p1023_p6, 1, 0 }
   0xe   : > { %p1028_p8 = pnand %p568_p5, %p164_p7  ;;  %s176_s28 = sshll.u32 %s946_s27, 4  ;;  %s1032_s28 = int_to_ptr.vmem [resolvable:$true] %s176_s28 }
   0xf   : > { %s947_s30 = smov [#allocation8]   ;;  %s948_s7 = smov [#allocation7]  }
  0x10   : > { %s1287_s26 = scalar_select %p1028_p8, 1, 0 }
  0x11   : > { %p646_p9 = pneg %p1028_p8  ;;  %s201_s6 = sshll.u32 %s947_s30, 4  ;;  %s1043_s6 = int_to_ptr.vmem [resolvable:$true] %s201_s6 }
  0x12   : > { %s1045_s8 = sshll.u32 %s948_s7, 4  ;;  %s728_s11 = scalar_lea.hbm %s1277_s1, 512  ;;  %s191_s8 = int_to_ptr.vmem [resolvable:$true] %s1045_s8 }
  0x13   : > { %p1039_p11 = pnand %p646_p9, %p1282_p1  ;;  %p729_p12 = scmp.ne.s32.totalorder %s1277_s1, %s728_s11 }
  0x14   : > { %p735_p5 = scmp.lt.u32.totalorder %s728_s11, %s1277_s1 }
  0x15   : > { %p1055_p13 = pneg %p1039_p11 }
  0x17   : > { %p731_p0 = pnand %p1055_p13, %p729_p12 }
  0x19   : > { %p732_p3 = pneg %p731_p0 }
  0x1b   : > { %p737_p7 = pnand %p735_p5, %p732_p3 }
  0x1d   : > { %740 = shalt.err (!%p737_p7)
}
  0x1e   : > { %s741_s17 = scalar_lea.vmem %s1032_s28, 512  ;;  %p749_p2 = scmp.lt.s32.totalorder %s1032_s28, %s1032_s28 }
  0x1f   : > { %p742_p9 = scmp.ne.s32.totalorder %s1032_s28, %s741_s17  ;;  %p750_p6 = scmp.lt.s32.totalorder %s741_s17, %s741_s17 }
  0x21   : > { %p744_p10 = pnand %p742_p9, %p1055_p13  ;;  %p751_p12 = por %p750_p6, %p749_p2 }
  0x23   : > { %p745_p1 = pneg %p744_p10 }
  0x25   : > { %p752_p0 = pnand %p751_p12, %p745_p1 }
  0x27   : > { %755 = shalt.err (!%p752_p0)
}
  0x28   : > { %s949_s23 = smov 64   ;;  %s950_s27 = smov 4  }
  0x29   : > { %649 = dma.hbm_to_vmem [thread:$0]  (!%p1039_p11), %s1277_s1, 512, %s1032_s28, [#allocation6], %s949_s23, %s949_s23, %s950_s27  }
  0x2a   : > { %s756_s11 = scalar_lea.hbm %s1279_s3, 16 }
  0x2b   : > { %p757_p1 = scmp.ne.s32.totalorder %s1279_s3, %s756_s11  ;;  %p763_p10 = scmp.lt.u32.totalorder %s756_s11, %s1279_s3 }
  0x2d   : > { %p759_p2 = pnand %p757_p1, %p1055_p13 }
  0x2f   : > { %p760_p6 = pneg %p759_p2 }
  0x31   : > { %p765_p3 = pnand %p763_p10, %p760_p6 }
  0x33   : > { %768 = shalt.err (!%p765_p3)
}
  0x34   : > { %s769_s28 = scalar_lea.vmem %s1043_s6, 16  ;;  %s776_s17 = scalar_lea.vmem %s1043_s6, 32 }
  0x35   : > { %p770_p5 = scmp.ne.s32.totalorder %s1043_s6, %s769_s28  ;;  %p777_p12 = scmp.lt.s32.totalorder %s1043_s6, %s1043_s6 }
  0x36   : > { %p778_p0 = scmp.lt.s32.totalorder %s776_s17, %s769_s28 }
  0x37   : > { %p772_p7 = pnand %p770_p5, %p1055_p13 }
  0x38   : > { %p779_p1 = por %p778_p0, %p777_p12 }
  0x39   : > { %p773_p9 = pneg %p772_p7 }
  0x3b   : > { %p780_p2 = pnand %p779_p1, %p773_p9 }
  0x3d   : > { %783 = shalt.err (!%p780_p2)
}
  0x3e   : > { %655 = dma.hbm_to_vmem [thread:$0]  (!%p1039_p11), %s1279_s3, 16, %s1043_s6, [#allocation9]  }
  0x3f   : > { %s784_s11 = scalar_lea.hbm %s1278_s2, 16 }
  0x40   : > { %p785_p6 = scmp.ne.s32.totalorder %s1278_s2, %s784_s11  ;;  %p791_p5 = scmp.lt.u32.totalorder %s784_s11, %s1278_s2 }
  0x42   : > { %p787_p10 = pnand %p785_p6, %p1055_p13 }
  0x44   : > { %p788_p3 = pneg %p787_p10 }
  0x46   : > { %p793_p7 = pnand %p791_p5, %p788_p3 }
  0x48   : > { %796 = shalt.err (!%p793_p7)
}
  0x49   : > { %s797_s28 = scalar_lea.vmem %s191_s8, 16  ;;  %s804_s6 = scalar_lea.vmem %s191_s8, 32 }
  0x4a   : > { %p798_p9 = scmp.ne.s32.totalorder %s191_s8, %s797_s28  ;;  %p805_p1 = scmp.lt.s32.totalorder %s191_s8, %s191_s8 }
  0x4b   : > { %p806_p2 = scmp.lt.s32.totalorder %s804_s6, %s797_s28 }
  0x4c   : > { %p800_p12 = pnand %p798_p9, %p1055_p13 }
  0x4d   : > { %p807_p4 = por %p806_p2, %p805_p1 }
  0x4e   : > { %p801_p0 = pneg %p800_p12 }
  0x50   : > { %p808_p8 = pnand %p807_p4, %p801_p0 }
  0x52   : > { %811 = shalt.err (!%p808_p8)
}
  0x53   : > { %652 = dma.hbm_to_vmem [thread:$0]  (!%p1039_p11), %s1278_s2, 16, %s191_s8, [#allocation6]  }
  0x54   : > { %s951_s7 = smov [#allocation10]   ;;  %s812_s12 = scalar_lea.hbm %s1280_s4, 16 }
  0x55   : > { %s212_s9 = sshll.u32 %s951_s7, 4  ;;  %p813_p6 = scmp.ne.s32.totalorder %s1280_s4, %s812_s12  ;;  %s213_s9 = int_to_ptr.vmem [resolvable:$true] %s212_s9 }
  0x56   : > { %p819_p10 = scmp.lt.u32.totalorder %s812_s12, %s1280_s4 }
  0x57   : > { %p815_p4 = pnand %p813_p6, %p1055_p13 }
  0x59   : > { %p816_p8 = pneg %p815_p4 }
  0x5b   : > { %p821_p3 = pnand %p819_p10, %p816_p8 }
  0x5d   : > { %824 = shalt.err (!%p821_p3)
}
  0x5e   : > { %s825_s8 = scalar_lea.vmem %s213_s9, 16  ;;  %s832_s6 = scalar_lea.vmem %s213_s9, 32 }
  0x5f   : > { %p826_p5 = scmp.ne.s32.totalorder %s213_s9, %s825_s8  ;;  %p833_p12 = scmp.lt.s32.totalorder %s213_s9, %s213_s9 }
  0x60   : > { %p834_p0 = scmp.lt.s32.totalorder %s832_s6, %s825_s8 }
  0x61   : > { %p828_p7 = pnand %p826_p5, %p1055_p13 }
  0x62   : > { %p835_p1 = por %p834_p0, %p833_p12 }
  0x63   : > { %p829_p9 = pneg %p828_p7 }
  0x65   : > { %p836_p2 = pnand %p835_p1, %p829_p9 }
  0x67   : > { %839 = shalt.err (!%p836_p2)
}
  0x68   : > { %658 = dma.hbm_to_vmem [thread:$0]  (!%p1039_p11), %s1280_s4, 16, %s213_s9, [#allocation9]  }
  0x69   : > { %s1141_s14 = sadd.s32 1, %s944_s21   ;;  %s30_s7 = sadd.s32 1, %s940_s20 }
  0x6a   : > { %s27_s29 = ssub.s32 %s944_s21, %s1141_s14  ;;  %p37_p13 = scmp.ne.s32.totalorder %s940_s20, %s936_s19 }
  0x6b   : > { %p28_p6 = scmp.eq.s32.totalorder %s27_s29, 0  ;;  %p38_p4 = scmp.eq.s32.totalorder %s944_s21, 0 }
  0x6c   : > { %p1290_p8 = scmp.eq.s32.totalorder %s1009_s22, 1  ;;  %p671_p3 = scmp.lt.s32.totalorder %s944_s21, 2 }
  0x6d   : > { %s1157_s11 = scalar_select %p28_p6, %s940_s20, %s30_s7  }
  0x6e   : > { %p1151_p10 = por %p1290_p8, %p37_p13  ;;  %p39_p5 = por %p38_p4, %p37_p13 }
  0x6f   : > { %s223_s12 = sand.u32 1, %s940_s20   ;;  %s600_s9 = sshll.u32 %s944_s21, 7 }
  0x70   : > { %s574_s13 = sshll.u32 %s223_s12, 3  ;;  %s1164_s28 = scalar_lea.hbm %s1276_s0, %s600_s9 }
  0x71   : > { %s227_s8 = scalar_lea.vmem [#allocation2], %s574_s13  ;;  %p1168_p11 = pnand %p671_p3, %p39_p5 }
  0x72   : > { %s234_s6 = sshll.u32 %s227_s8, 4  ;;  %s1172_s30 = scalar_lea.sflag [#allocation3], %s223_s12  ;;  %s1166_s6 = int_to_ptr.vmem [resolvable:$true] %s234_s6 }
  0x73   : > { %s840_s7 = scalar_lea.hbm %s1164_s28, 128  ;;  %p842_p9 = pneg %p1168_p11 }
  0x74   : > { %p841_p7 = scmp.ne.s32.totalorder %s1164_s28, %s840_s7  ;;  %s845_s9 = scalar_lea.hbm %s1276_s0, 256 }
  0x75   : > { %p846_p1 = scmp.lt.u32.totalorder %s1164_s28, %s1276_s0  ;;  %p847_p2 = scmp.lt.u32.totalorder %s845_s9, %s840_s7 }
  0x76   : > { %p843_p12 = pnand %p842_p9, %p841_p7  ;;  %p849_p6 = scmp.lt.u32.totalorder %s840_s7, %s1164_s28 }
  0x77   : > { %p848_p13 = por %p847_p2, %p846_p1 }
  0x78   : > { %p844_p0 = pneg %p843_p12 }
  0x79   : > { %p850_p4 = por %p849_p6, %p848_p13 }
  0x7b   : > { %p851_p8 = pnand %p850_p4, %p844_p0 }
  0x7d   : > { %854 = shalt.err (!%p851_p8)
}
  0x7e   : > { %s855_s12 = scalar_lea.vmem %s1166_s6, 128  ;;  %s952_s8 = smov [#allocation2]  }
  0x7f   : > { %p856_p3 = scmp.ne.s32.totalorder %s1166_s6, %s855_s12  ;;  %s860_s29 = sshll.u32 %s952_s8, 4  ;;  %s861_s29 = int_to_ptr.vmem [resolvable:$false] %s860_s29 }
  0x80   : > { %s862_s13 = scalar_lea.vmem %s861_s29, 256  ;;  %p863_p12 = scmp.lt.s32.totalorder %s1166_s6, %s861_s29 }
  0x81   : > { %p858_p5 = pnand %p856_p3, %p842_p9  ;;  %p864_p1 = scmp.lt.s32.totalorder %s862_s13, %s855_s12 }
  0x83   : > { %p859_p7 = pneg %p858_p5  ;;  %p865_p2 = por %p864_p1, %p863_p12 }
  0x85   : > { %p866_p13 = pnand %p865_p2, %p859_p7 }
  0x87   : > { %869 = shalt.err (!%p866_p13)
}
  0x88   : > { %662 = dma.hbm_to_vmem [thread:$0]  (!%p1168_p11), %s1164_s28, 128, %s1166_s6, %s1172_s30, %s949_s23, %s949_s23, %s950_s27  }
  0x89   : > { %p1293_p9 = scmp.ne.s32.totalorder %s1287_s26, 0 }
  0x8a   : > { %s1206_s7 = sand.u32 (!%p1293_p9), 1, %s936_s19   ;;  %p1294_p0 = scmp.ne.s32.totalorder (!%p1293_p9), %s1285_s24, 0 }
  0x8b   : > { %246 = sbr.rel (%p1293_p9) target bundleno = 719 (0x2cf), region = 40  ;;  %s578_s9 = sshll.u32 (!%p1293_p9), %s1206_s7, 3 }
  0x8c   : > { %s249_s15 = scalar_lea.sflag (!%p1293_p9), [#allocation3], %s1206_s7  ;;  %s252_s17 = scalar_lea.vmem (!%p1293_p9), [#allocation2], %s578_s9 }
  0x92   : > { %915 = dma.done.wait (%p1294_p0), %s249_s15, 128  }
  0x93   : > { %917 = vsyncadd (%p1294_p0), %s249_s15, 4294967168  ;;  %p1295_p11 = scmp.eq.s32.totalorder %s1009_s22, 0 }
  0x95   : > { %919 = dma.done.wait (%p1295_p11), [#allocation6], 528   ;;  %p1296_p6 = pmov %p1295_p11 }
  0x97   : > { %921 = vsyncadd (%p1296_p6), [#allocation6], 4294966768  ;;  %p1297_p4 = pmov %p1296_p6 }
  0x99   : > { %923 = dma.done.wait (%p1297_p4), [#allocation9], 32   ;;  %p1298_p8 = pmov %p1297_p4 }
  0x9a   : > { %v953_v0 = vmov 0.0   ;;  %vm954_vm0 = vmmov 0   ;;  %v719_v1 = vld [vmem:[#allocation5] sm:$0xff]   ;;  %v720_v2 = vld [vmem:[#allocation5 + $0x8] sm:$0xff]   ;;  %v721_v3 = vld [vmem:[#allocation5 + $0x10] sm:$0xff]   ;;  %vm344_vm1 = vcmask 523264  }
  0x9b   : > { %925 = vsyncadd (%p1298_p8), [#allocation9], 4294967264  ;;  %614 = vmatprep.subr.bf16.mxu0 %v953_v0  ;;  %622 = vmatprep.mubr.msk.bf16.mxu0 %vm954_vm0, %v953_v0  ;;  %v722_v4 = vld [vmem:[#allocation5 + $0x18] sm:$0xff]   ;;  %v584_v6 = vld [vmem:[#allocation7] ss:$0 sm:$0xff]  ;;  %s603_s24 = sshll.u32 %s1009_s22, 7 }
  0x9c   : > { %615 = vmatpush3.bf16.msra.mxu0 %v719_v1  ;;  %v723_v5 = vld [vmem:[%s252_s17] sm:$0xff]   ;;  %v591_v31 = vld [vmem:[#allocation8] ss:$0 sm:$0xff]  ;;  %v592_v35 = vld [vmem:[#allocation10] ss:$0 sm:$0xff]  ;;  %s294_s26 = scalar_lea.vmem [#allocation11], %s578_s9  ;;  %s1230_s6 = scalar_lea.hbm %s1281_s5, %s603_s24 }
  0x9d   : > { %616 = vmatprep.subr.bf16.mxu0 %v953_v0  ;;  %s456_s23 = sshll.u32 %s294_s26, 4  ;;  %s443_s30 = scalar_lea.sflag [#allocation4], %s1206_s7  ;;  %s1232_s23 = int_to_ptr.vmem [resolvable:$true] %s456_s23 }
  0x9e   : > { %s870_s16 = scalar_lea.vmem %s1232_s23, 128  ;;  %s955_s22 = smov [#allocation11]  }
  0x9f   : > { %p871_p3 = scmp.ne.s32.totalorder %s1232_s23, %s870_s16  ;;  %s874_s12 = sshll.u32 %s955_s22, 4  ;;  %s875_s12 = int_to_ptr.vmem [resolvable:$false] %s874_s12 }
  0xa0   : > { %617 = vmatpush3.bf16.msra.mxu0 %v720_v2  ;;  %s876_s8 = scalar_lea.vmem %s875_s12, 256  ;;  %p877_p12 = scmp.lt.s32.totalorder %s1232_s23, %s875_s12 }
  0xa1   : > { %618 = vmatprep.subr.bf16.mxu0 %v953_v0  ;;  %p872_p5 = pnand %p871_p3, %p1151_p10  ;;  %p878_p1 = scmp.lt.s32.totalorder %s876_s8, %s870_s16 }
  0xa3   : > { %p873_p7 = pneg %p872_p5  ;;  %p879_p2 = por %p878_p1, %p877_p12 }
  0xa4   : > { %619 = vmatpush3.bf16.msra.mxu0 %v721_v3 }
  0xa5   : > { %620 = vmatprep.subr.bf16.mxu0 %v953_v0  ;;  %p880_p13 = pnand %p879_p2, %p873_p7 }
  0xa8   : > { %621 = vmatpush3.bf16.msra.mxu0 %v722_v4 }
  0xab   : > { %623 = vmatmul.mubr.msk.bf16.vlgmr.msra.gmra.mrb[0].mxu0 %vm344_vm1, %v723_v5 }
 0x17e   : > { %v382_v7 = vpop.f32.mrb[0].mxu0 }
 0x17f   : > { %v383_v8 = vadd.f32 %v584_v6, %v382_v7  ;;  %v624_v9 = vpop.f32.mrb[1].mxu0 }
 0x180   : > { %v385_v10 = vpop.f32.mrb[2].mxu0 }
 0x181   : > { %v389_v11 = vmax.f32 %v383_v8, 0.0  ;;  %v386_v12 = vadd.f32 %v584_v6, %v385_v10  ;;  %v625_v13 = vpop.f32.mrb[3].mxu0 }
 0x183   : > { %391 = vadd.xlane.f32.xlu0 %v389_v11  ;;  %v390_v14 = vmax.f32 %v386_v12, 0.0 }
 0x187   : > { %393 = vadd.xlane.f32.xlu0 %v390_v14 }
 0x210   : > { %v392_v15 = vpop.xlane.xlu0 %391 }
 0x211   : > { %v396_v16 = vmul.f32 0.0078125, %v392_v15 }
 0x213   : > { %v398_v17 = vsub.f32 %v389_v11, %v396_v16 }
 0x214   : > { %v394_v18 = vpop.xlane.xlu0 %393 }
 0x215   : > { %v397_v19 = vmul.f32 0.0078125, %v394_v18  ;;  %v400_v20 = vmul.f32 %v398_v17, %v398_v17 }
 0x217   : > { %v399_v21 = vsub.f32 %v390_v14, %v397_v19  ;;  %402 = vadd.xlane.f32.xlu1 %v400_v20 }
 0x219   : > { %v401_v22 = vmul.f32 %v399_v21, %v399_v21 }
 0x21b   : > { %404 = vadd.xlane.f32.xlu1 %v401_v22 }
 0x2a4   : > { %v403_v23 = vpop.xlane.xlu1 %402 }
 0x2a5   : > { %v406_v24 = vmul.f32 0.0078125, %v403_v23 }
 0x2a7   : > { %v408_v25 = vadd.f32 1e-05, %v406_v24 }
 0x2a8   : > { %v405_v26 = vpop.xlane.xlu1 %404 }
 0x2a9   : > { %724 = vrsqrt.f32 %v408_v25  ;;  %v407_v27 = vmul.f32 0.0078125, %v405_v26 }
 0x2ab   : > { %v409_v28 = vadd.f32 1e-05, %v407_v27 }
 0x2ad   : > { %726 = vrsqrt.f32 %v409_v28 }
 0x2b3   : > { %v725_v29 = vpop.eup %724 }
 0x2b4   : > { %v412_v30 = vmul.f32 %v725_v29, %v398_v17 }
 0x2b6   : > { %v421_v33 = vmul.f32 %v591_v31, %v412_v30 }
 0x2b7   : > { %v727_v32 = vpop.eup %726 }
 0x2b8   : > { %v413_v34 = vmul.f32 %v727_v32, %v399_v21  ;;  %v430_v37 = vadd.f32 %v592_v35, %v421_v33 }
 0x2ba   : > { %v422_v36 = vmul.f32 %v591_v31, %v413_v34 }
 0x2bc   : > { %v431_v38 = vadd.f32 %v592_v35, %v422_v36 }
 0x2be   : > { %v607_v39 = vpack.c.bf16 %v431_v38, %v430_v37 }
 0x2c0   : > { %608 = vst [vmem:[%s294_s26] sm:$0xff] %v607_v39  }
 0x2c1   : > { %883 = shalt.err (!%p880_p13)
}
 0x2c2   : > { %s884_s29 = scalar_lea.hbm %s1230_s6, 128  ;;  %s888_s15 = scalar_lea.hbm %s1281_s5, 256 }
 0x2c3   : > { %p885_p9 = scmp.ne.s32.totalorder %s1230_s6, %s884_s29  ;;  %p889_p6 = scmp.lt.u32.totalorder %s1230_s6, %s1281_s5 }
 0x2c4   : > { %p890_p4 = scmp.lt.u32.totalorder %s888_s15, %s884_s29  ;;  %p892_p3 = scmp.lt.u32.totalorder %s884_s29, %s1230_s6 }
 0x2c5   : > { %p886_p0 = pnand %p885_p9, %p1151_p10 }
 0x2c6   : > { %p891_p8 = por %p890_p4, %p889_p6 }
 0x2c7   : > { %p887_p11 = pneg %p886_p0 }
 0x2c8   : > { %p893_p5 = por %p892_p3, %p891_p8 }
 0x2ca   : > { %p894_p7 = pnand %p893_p5, %p887_p11 }
 0x2cc   : > { %897 = shalt.err (!%p894_p7)
}
 0x2cd   : > { %s956_s26 = smov 64   ;;  %s957_s27 = smov 4  }
 0x2ce   : > { %644 = dma.vmem_to_hbm [thread:$0]  (%p1151_p10), %s1232_s23, 128, %s1230_s6, %s443_s30, %s956_s26, %s956_s26, %s957_s27  }
 0x2cf PF: > { %s471_s28 = sand.u32 1, %s932_s18   ;;  %p1299_p12 = scmp.ne.s32.totalorder %s1286_s25, 0 }
 0x2d0   : > { %p1300_p1 = scmp.ge.s32.totalorder %s944_s21, 2  ;;  %s472_s16 = scalar_lea.sflag [#allocation4], %s471_s28 }
 0x2d2   : > { %p664_p2 = pnand %p1300_p1, %p1299_p12 }
 0x2d4   : > { %927 = dma.done.wait (!%p664_p2), %s472_s16, 128  }
 0x2d5   : > { %929 = vsyncadd (!%p664_p2), %s472_s16, 4294967168  ;;  %p20_p13 = scmp.ge.s32.totalorder %s1141_s14, 4   ;;  %s1301_s18 = smov %s936_s19 }
 0x2d6   : > { %s1302_s19 = smov %s940_s20  ;;  %s1303_s20 = smov %s1157_s11 }
 0x2d7   : > { %s1304_s21 = smov %s1141_s14  ;;  %22 = sbr.rel (!%p20_p13) target bundleno = 7 (0x7), region = 101 }
 0x2de   :  { %477 = vsyncpa [#allocation3], 1 }
 0x2df   :  { %479 = vsyncpa [#allocation3 + $0x1], 1 }
 0x2e0   :  { %480 = vsyncpa [#allocation6], 1 }
 0x2e1   :  { %481 = vsyncpa [#allocation9], 1 }
 0x2e2   :  { %482 = vsyncpa [#allocation4], 1 }
 0x2e3   :  { %484 = vsyncpa [#allocation4 + $0x1], 1 }

</bundles_post_ra>
